<compile_context>
chip_gen: v7x
topology: tpu7x:2x2x1
jax: 0.10.0
libtpu: 0.0.40
codegen_flags: <defaults>
</compile_context>

<pallas_src>
import jax
import jax.numpy as jnp
from jax.experimental import pallas as pl
from jax.experimental.pallas import tpu as pltpu


def _round_up(x, m):
    return ((x + m - 1) // m) * m


# ---------------------------------------------------------------------------
# Kernels
# ---------------------------------------------------------------------------

def _linear_vpu_kernel(x_ref, w_ref, b_ref, o_ref):
    """Broadcast-MAC for tiny C / C_out (keeps the kernel memory-bound).

    x_ref: (B_blk, C,     t_hw)   activations, lanes = spatial positions
    w_ref: (C,     C_out, 1)      weight columns (transposed nn.Linear weight)
    b_ref: (C_out, 1)             bias column
    o_ref: (B_blk, C_out, t_hw)   lane-dense output tile
    """
    C = x_ref.shape[1]
    x = x_ref[...].astype(jnp.float32)                 # (B_blk, C, t_hw)
    w = w_ref[...].astype(jnp.float32)                 # (C, C_out, 1)
    b = b_ref[...].astype(jnp.float32)                 # (C_out, 1)
    # Bias folded into the accumulator init.
    acc = jnp.broadcast_to(b[None, :, :], o_ref.shape)
    for c in range(C):                                  # C is small & static
        # (1, C_out, 1) * (B_blk, 1, t_hw) -> (B_blk, C_out, t_hw):
        # ~1 vmul + 1 vadd per output vreg; the lane/sublane broadcasts are cheap.
        acc = acc + w[c][None, :, :] * x[:, c:c + 1, :]
    o_ref[...] = acc.astype(o_ref.dtype)


def _linear_mxu_kernel(x_ref, w_ref, b_ref, o_ref):
    """MXU fallback for larger channel counts.

    x_ref: (B_blk, C, t_hw); w_ref: (C_out, C); b_ref: (C_out, 1)
    o_ref: (B_blk, C_out, t_hw)
    """
    w = w_ref[...]
    b = b_ref[...].astype(jnp.float32)
    for bb in range(x_ref.shape[0]):                    # B_blk is small & static
        y = jnp.dot(w, x_ref[bb], preferred_element_type=jnp.float32)
        o_ref[bb] = (y + b).astype(o_ref.dtype)


# ---------------------------------------------------------------------------
# Tiling selection
# ---------------------------------------------------------------------------

def _choose_blocks(B, C, C_out, HW, itemsize,
                   vmem_budget_bytes=8 * 1024 * 1024,
                   target_step_bytes=2 * 1024 * 1024,
                   max_lanes_cap=65536):
    """Pick (B_blk, t_hw, n_b, n_t).

    Each grid step should move ~target_step_bytes of HBM traffic (amortizing the
    ~0.35 us per-step pipeline overhead) while the sublane-padded, double-buffered
    blocks stay inside a conservative VMEM budget (safe on v5e/v6e/v7x).
    """
    # HBM traffic per spatial position per batch element.
    traffic_per_lane = (C + C_out) * itemsize
    # VMEM footprint per spatial position per batch element (pad-aware, x2 for
    # double buffering of both the input and the output block).
    vmem_per_lane = 2 * (_round_up(C, 8) + _round_up(C_out, 8)) * itemsize

    max_lanes = max(128, vmem_budget_bytes // vmem_per_lane)
    want_lanes = max(128, -(-target_step_bytes // traffic_per_lane))
    lane_cap = min(max_lanes, want_lanes, max_lanes_cap)

    if HW <= lane_cap:
        t_hw = HW                        # full-extent spatial block (any size OK)
    else:
        t_hw = (lane_cap // 128) * 128   # tiled: lane count must be %128 == 0

    B_blk = 1
    if t_hw == HW:
        # Small feature map: pack several batch elements per step so per-step
        # DMA stays large (order-of-magnitude win for small H*W).
        step_bytes = HW * traffic_per_lane
        B_blk = max(1, min(B,
                           target_step_bytes // max(step_bytes, 1),
                           vmem_budget_bytes // max(HW * vmem_per_lane, 1)))

    n_b = pl.cdiv(B, B_blk)
    n_t = pl.cdiv(HW, t_hw)

    # v7x has 2 TensorCores sharded over the "parallel" grid axes: make sure the
    # grid has at least 2 points whenever the problem can be split.
    if n_b * n_t < 2:
        if B >= 2:
            B_blk = -(-B // 2)
            n_b = pl.cdiv(B, B_blk)
        elif HW >= 256:
            t_split = min(HW, _round_up(-(-HW // 2), 128))
            if t_split < HW:
                t_hw = t_split
                n_t = pl.cdiv(HW, t_hw)

    return B_blk, t_hw, n_b, n_t


# ---------------------------------------------------------------------------
# Forward wrapper
# ---------------------------------------------------------------------------

def flatten_spatial_dimensions_forward(x, weight, bias):
    """Equivalent of FlattenSpatialDimensions(nn.Linear(C, C_out)).forward(x).

    x:      [B, C, *spatial]  (channels-first, matching PyTorch)
    weight: [C_out, C]        (PyTorch nn.Linear convention)
    bias:   [C_out]
    returns [B, C_out, *spatial]
    """
    B, C = int(x.shape[0]), int(x.shape[1])
    spatial = tuple(int(s) for s in x.shape[2:])
    HW = 1
    for s in spatial:
        HW *= s
    C_out = int(weight.shape[0])
    itemsize = jnp.dtype(x.dtype).itemsize

    # [B, C, *S] -> [B, C, H*W]: metadata-only reshape, no HBM transpose.
    x2d = x.reshape(B, C, HW)
    bias_col = bias.reshape(C_out, 1)

    B_blk, t_hw, n_b, n_t = _choose_blocks(B, C, C_out, HW, itemsize)

    # Tiny contraction / few output channels -> VPU broadcast-MAC; otherwise MXU.
    use_vpu = (C <= 16) and (C_out <= 32)
    if use_vpu:
        kernel = _linear_vpu_kernel
        w_arg = weight.T.reshape(C, C_out, 1)          # tiny one-time layout transform
        w_spec = pl.BlockSpec((C, C_out, 1), lambda b, t: (0, 0, 0))
    else:
        kernel = _linear_mxu_kernel
        w_arg = weight
        w_spec = pl.BlockSpec((C_out, C), lambda b, t: (0, 0))

    cost = pl.CostEstimate(
        flops=2 * B * HW * C * C_out,
        transcendentals=0,
        bytes_accessed=(B * (C + C_out) * HW + C_out * (C + 1)) * itemsize,
    )

    out2d = pl.pallas_call(
        kernel,
        out_shape=jax.ShapeDtypeStruct((B, C_out, HW), x.dtype),
        grid=(n_b, n_t),
        in_specs=[
            pl.BlockSpec((B_blk, C, t_hw), lambda b, t: (b, 0, t)),
            w_spec,                                    # resident weight
            pl.BlockSpec((C_out, 1), lambda b, t: (0, 0)),   # resident bias
        ],
        out_specs=pl.BlockSpec((B_blk, C_out, t_hw), lambda b, t: (b, 0, t)),
        compiler_params=pltpu.CompilerParams(
            dimension_semantics=("parallel", "parallel"),
            vmem_limit_bytes=32 * 1024 * 1024,   # safe on v5e/v6e/v7x (64 MiB phys on v7x)
        ),
        cost_estimate=cost,
    )(x2d, w_arg, bias_col)

    # [B, C_out, H*W] -> [B, C_out, *S]: metadata-only reshape.
    return out2d.reshape((B, C_out) + spatial)


# ---------------------------------------------------------------------------
# Self-test
# ---------------------------------------------------------------------------

if __name__ == "__main__":
    def reference(x, w, b):
        # PyTorch: flatten(2).permute(0,2,1) -> Linear -> permute back / view
        y = jnp.einsum("bchw,oc->bohw", x, w)
        return y + b[None, :, None, None]

    key = jax.random.PRNGKey(0)

    # Case 1: canonical small shape for this module.
    k1, k2, k3, key = jax.random.split(key, 4)
    x = jax.random.normal(k1, (2, 4, 16, 16), dtype=jnp.float32)
    weight = jax.random.normal(k2, (8, 4), dtype=jnp.float32) * 0.1
    bias = jax.random.normal(k3, (8,), dtype=jnp.float32) * 0.1
    out = jax.block_until_ready(flatten_spatial_dimensions_forward(x, weight, bias))
    assert out.shape == (2, 8, 16, 16)
    assert jnp.allclose(out, reference(x, weight, bias), atol=1e-5, rtol=1e-5)

    # Case 2: ragged shapes (odd batch -> ragged batch block, H*W=225 not a
    # multiple of 128) to exercise Pallas' out-of-bounds masking explicitly.
    k1, k2, k3, key = jax.random.split(key, 4)
    x2 = jax.random.normal(k1, (3, 4, 15, 15), dtype=jnp.float32)
    w2 = jax.random.normal(k2, (8, 4), dtype=jnp.float32) * 0.1
    b2 = jax.random.normal(k3, (8,), dtype=jnp.float32) * 0.1
    out2 = jax.block_until_ready(flatten_spatial_dimensions_forward(x2, w2, b2))
    assert out2.shape == (3, 8, 15, 15)
    assert jnp.allclose(out2, reference(x2, w2, b2), atol=1e-5, rtol=1e-5)

    print("KERNEL_OK")
</pallas_src>

<mosaic_0001>
module attributes {stable_mosaic.version = 11 : i64} {
  func.func @_linear_vpu_kernel(%arg0: i32, %arg1: i32, %arg2: memref<1x4x256xf32, #tpu.memory_space<vmem>>, %arg3: memref<4x8x1xf32, #tpu.memory_space<vmem>>, %arg4: memref<8x1xf32, #tpu.memory_space<vmem>>, %arg5: memref<1x8x256xf32, #tpu.memory_space<vmem>>) attributes {dimension_semantics = [#tpu.dimension_semantics<parallel>, #tpu.dimension_semantics<parallel>], iteration_bounds = array<i64: 2, 1>, scalar_prefetch = 0 : i64, scratch_operands = 0 : i64, tpu.core_type = #tpu.core_type<tc>, window_params = [{transform_indices = @transform_0, window_bounds = array<i64: 1, 4, 256>}, {pipeline_mode = #tpu.pipeline_mode<synchronous>, transform_indices = @transform_1, window_bounds = array<i64: 4, 8, 1>}, {pipeline_mode = #tpu.pipeline_mode<synchronous>, transform_indices = @transform_2, window_bounds = array<i64: 8, 1>}, {transform_indices = @transform_3, window_bounds = array<i64: 1, 8, 256>}]} {
    %c0 = arith.constant 0 : index
    %c0_0 = arith.constant 0 : index
    %c0_1 = arith.constant 0 : index
    %0 = vector.load %arg2[%c0, %c0_0, %c0_1] : memref<1x4x256xf32, #tpu.memory_space<vmem>>, vector<1x4x256xf32>
    %c0_2 = arith.constant 0 : index
    %c0_3 = arith.constant 0 : index
    %c0_4 = arith.constant 0 : index
    %1 = vector.load %arg3[%c0_2, %c0_3, %c0_4] : memref<4x8x1xf32, #tpu.memory_space<vmem>>, vector<4x8x1xf32>
    %c0_5 = arith.constant 0 : index
    %c0_6 = arith.constant 0 : index
    %2 = vector.load %arg4[%c0_5, %c0_6] : memref<8x1xf32, #tpu.memory_space<vmem>>, vector<8x1xf32>
    %3 = vector.shape_cast %2 : vector<8x1xf32> to vector<1x8x1xf32>
    %4 = vector.shape_cast %3 : vector<1x8x1xf32> to vector<1x8x1xf32>
    %5 = vector.broadcast %4 : vector<1x8x1xf32> to vector<1x8x256xf32>
    %6 = vector.extract_strided_slice %1 {offsets = [0, 0, 0], sizes = [1, 8, 1], strides = [1, 1, 1]} : vector<4x8x1xf32> to vector<1x8x1xf32>
    %7 = vector.shape_cast %6 : vector<1x8x1xf32> to vector<8x1xf32>
    %8 = vector.shape_cast %7 : vector<8x1xf32> to vector<1x8x1xf32>
    %9 = vector.extract_strided_slice %0 {offsets = [0, 0, 0], sizes = [1, 1, 256], strides = [1, 1, 1]} : vector<1x4x256xf32> to vector<1x1x256xf32>
    %10 = vector.broadcast %8 : vector<1x8x1xf32> to vector<1x8x256xf32>
    %11 = vector.broadcast %9 : vector<1x1x256xf32> to vector<1x8x256xf32>
    %12 = arith.mulf %10, %11 : vector<1x8x256xf32>
    %13 = arith.addf %5, %12 : vector<1x8x256xf32>
    %14 = vector.extract_strided_slice %1 {offsets = [1, 0, 0], sizes = [1, 8, 1], strides = [1, 1, 1]} : vector<4x8x1xf32> to vector<1x8x1xf32>
    %15 = vector.shape_cast %14 : vector<1x8x1xf32> to vector<8x1xf32>
    %16 = vector.shape_cast %15 : vector<8x1xf32> to vector<1x8x1xf32>
    %17 = vector.extract_strided_slice %0 {offsets = [0, 1, 0], sizes = [1, 1, 256], strides = [1, 1, 1]} : vector<1x4x256xf32> to vector<1x1x256xf32>
    %18 = vector.broadcast %16 : vector<1x8x1xf32> to vector<1x8x256xf32>
    %19 = vector.broadcast %17 : vector<1x1x256xf32> to vector<1x8x256xf32>
    %20 = arith.mulf %18, %19 : vector<1x8x256xf32>
    %21 = arith.addf %13, %20 : vector<1x8x256xf32>
    %22 = vector.extract_strided_slice %1 {offsets = [2, 0, 0], sizes = [1, 8, 1], strides = [1, 1, 1]} : vector<4x8x1xf32> to vector<1x8x1xf32>
    %23 = vector.shape_cast %22 : vector<1x8x1xf32> to vector<8x1xf32>
    %24 = vector.shape_cast %23 : vector<8x1xf32> to vector<1x8x1xf32>
    %25 = vector.extract_strided_slice %0 {offsets = [0, 2, 0], sizes = [1, 1, 256], strides = [1, 1, 1]} : vector<1x4x256xf32> to vector<1x1x256xf32>
    %26 = vector.broadcast %24 : vector<1x8x1xf32> to vector<1x8x256xf32>
    %27 = vector.broadcast %25 : vector<1x1x256xf32> to vector<1x8x256xf32>
    %28 = arith.mulf %26, %27 : vector<1x8x256xf32>
    %29 = arith.addf %21, %28 : vector<1x8x256xf32>
    %30 = vector.extract_strided_slice %1 {offsets = [3, 0, 0], sizes = [1, 8, 1], strides = [1, 1, 1]} : vector<4x8x1xf32> to vector<1x8x1xf32>
    %31 = vector.shape_cast %30 : vector<1x8x1xf32> to vector<8x1xf32>
    %32 = vector.shape_cast %31 : vector<8x1xf32> to vector<1x8x1xf32>
    %33 = vector.extract_strided_slice %0 {offsets = [0, 3, 0], sizes = [1, 1, 256], strides = [1, 1, 1]} : vector<1x4x256xf32> to vector<1x1x256xf32>
    %34 = vector.broadcast %32 : vector<1x8x1xf32> to vector<1x8x256xf32>
    %35 = vector.broadcast %33 : vector<1x1x256xf32> to vector<1x8x256xf32>
    %36 = arith.mulf %34, %35 : vector<1x8x256xf32>
    %37 = arith.addf %29, %36 : vector<1x8x256xf32>
    %c0_7 = arith.constant 0 : index
    %c0_8 = arith.constant 0 : index
    %c0_9 = arith.constant 0 : index
    %38 = vector.load %arg5[%c0_7, %c0_8, %c0_9] : memref<1x8x256xf32, #tpu.memory_space<vmem>>, vector<1x8x256xf32>
    tpu.vector_store %arg5[%c0_7, %c0_8, %c0_9], %37 {strides = array<i32>} : memref<1x8x256xf32, #tpu.memory_space<vmem>>, vector<1x8x256xf32>,
    return
  }
  func.func @transform_0(%arg0: i32, %arg1: i32) -> (i32, i32, i32) {
    %c0_i32 = arith.constant 0 : i32
    %c0_i32_0 = arith.constant 0 : i32
    return %arg0, %c0_i32, %arg1 : i32, i32, i32
  }
  func.func @transform_1(%arg0: i32, %arg1: i32) -> (i32, i32, i32) {
    %c0_i32 = arith.constant 0 : i32
    %c0_i32_0 = arith.constant 0 : i32
    %c0_i32_1 = arith.constant 0 : i32
    %c0_i32_2 = arith.constant 0 : i32
    return %c0_i32, %c0_i32_0, %c0_i32_1 : i32, i32, i32
  }
  func.func @transform_2(%arg0: i32, %arg1: i32) -> (i32, i32) {
    %c0_i32 = arith.constant 0 : i32
    %c0_i32_0 = arith.constant 0 : i32
    %c0_i32_1 = arith.constant 0 : i32
    return %c0_i32, %c0_i32_0 : i32, i32
  }
  func.func @transform_3(%arg0: i32, %arg1: i32) -> (i32, i32, i32) {
    %c0_i32 = arith.constant 0 : i32
    %c0_i32_0 = arith.constant 0 : i32
    return %arg0, %c0_i32, %arg1 : i32, i32, i32
  }
}

</mosaic_0001>

<bundles_post_ra>
// kernel: tpu_custom_call.1
= control target key start
LH: loop header
LB: loop body
LE: loop exit
PB: predicated region body
PF: predicated region fallthrough
CT: control target
= control target key end

     0   :  { %8 = vsyncpa [#allocation3], 0  ;;  %s721_s0 = inlined_call_operand.vmem [shape: f32[2,4,256], index: 0, kind: input, shape index: {}]   ;;  %s722_s1 = inlined_call_operand.vmem [shape: f32[4,8,1], index: 1, kind: input, shape index: {}]   ;;  %s723_s2 = inlined_call_operand.vmem [shape: f32[8,1], index: 2, kind: input, shape index: {}]   ;;  %s724_s3 = inlined_call_operand.hbm [shape: f32[2,8,256], index: 3, kind: output, shape index: {}]  }
   0x1   :  { %10 = vsyncpa [#allocation3 + $0x1], 0  ;;  %s590_s12 = smov 0   ;;  %s592_s13 = smov 0  }
   0x2   :  { %s594_s14 = smov 0   ;;  %s596_s15 = smov 0  }
   0x3   :  { %s598_s16 = smov 0   ;;  %s600_s17 = smov 0  }
   0x4 LB: > { %s415_s18 = sadd.s32 4294967295, %s566_s17   ;;  %s416_s19 = sadd.s32 4294967294, %s566_s17   ;;  %s566_s17 = sphi %s600_s17, %s16_s17   ;;  %s562_s16 = sphi %s598_s16, %s731_s16   ;;  %s558_s15 = sphi %s596_s15, %s730_s15   ;;  %s554_s14 = sphi %s594_s14, %s729_s14   ;;  %s550_s13 = sphi %s592_s13, %s728_s13   ;;  %s546_s12 = sphi %s590_s12, %s727_s12  }
   0x5   : > { %s28_s20 = sadd.s32 1, %s562_s16  ;;  %s107_s21 = sadd.s32 1, %s554_s14 }
   0x6   : > { %p30_p0 = scmp.ge.s32.totalorder %s28_s20, 2  ;;  %p117_p1 = scmp.ne.s32.totalorder %s554_s14, %s550_s13 }
   0x7   : > { %p118_p2 = scmp.eq.s32.totalorder %s415_s18, 1  ;;  %p123_p3 = scmp.ne.s32.totalorder %s550_s13, %s546_s12 }
   0x8   : > { %s733_s20 = smov (%p30_p0, %s28_s20), 0  ;;  %p124_p5 = scmp.eq.s32.totalorder %s416_s19, 1 }
   0x9   : > { %p630_p4 = por %p118_p2, %p117_p1  ;;  %s102_s23 = ssub.s32 %s562_s16, %s733_s20 }
   0xa   : > { %p419_p6 = scmp.ge.s32.totalorder %s566_s17, 1  ;;  %p105_p7 = scmp.eq.s32.totalorder %s102_s23, 0 }
   0xb   : > { %p637_p8 = por %p124_p5, %p123_p3  ;;  %p161_p9 = scmp.lt.s32.totalorder %s566_s17, 3 }
   0xc   : > { %s643_s25 = scalar_select %p105_p7, %s554_s14, %s107_s21  }
   0xd   : > { %p162_p10 = pnand %p419_p6, %p161_p9 }
   0xe   : > { %v202_v0 = vld [vmem:[%s722_s1 + $0x8] sm:$0xff] (!%p162_p10)  ;;  %v201_v1 = vld [vmem:[%s722_s1] sm:$0xff] (!%p162_p10)  ;;  %v568_v2 = vmov (!%p162_p10), 0   ;;  %v203_v3 = vld [vmem:[%s722_s1 + $0x10] sm:$0xff] (!%p162_p10)  ;;  %p190_p11 = scmp.lt.s32.totalorder (!%p162_p10), %s558_s15, 1  ;;  %v217_v6 = vlaneseq (!%p162_p10)  ;;  %s186_s21 = sand.u32 (!%p162_p10), 1, %s550_s13  }
   0xf   : > { %165 = sbr.rel (%p162_p10) target bundleno = 170 (0xaa), region = 32  ;;  %487 = vset.pattern.permute.xlu1 (!%p162_p10), %v568_v2  ;;  %486 = vset.pattern.permute.xlu0 (!%p162_p10), %v568_v2  ;;  %v205_v4 = vld [vmem:[%s723_s2] sm:$0xff] (!%p162_p10)  ;;  %v204_v5 = vld [vmem:[%s722_s1 + $0x18] sm:$0xff] (!%p162_p10)  ;;  %s420_s23 = sshll.u32 (!%p162_p10), %s186_s21, 4 }
  0x10   : > { %241 = vperm.xlu1 (!%p162_p10), %487, %v202_v0   ;;  %213 = vperm.xlu0 (!%p162_p10), %486, %v201_v1   ;;  %v218_v7 = vshrl.u32 (!%p162_p10), %v217_v6, 7  ;;  %s429_s26 = sshll.u32 (!%p162_p10), %s558_s15, 8  ;;  %s188_s27 = scalar_lea.vmem (!%p162_p10), [#allocation2], %s420_s23 }
  0x11   : > { %s339_s28 = sshll.u32 (!%p162_p10), %s188_s27, 4  ;;  %s672_s4 = scalar_lea.hbm (!%p162_p10), %s724_s3, %s429_s26  ;;  %s674_s28 = int_to_ptr.vmem [resolvable:$true] %s339_s28 }
  0x12   : > { %v219_v8 = vsub.s32 (!%p162_p10), 0, %v218_v7  ;;  %v223_v9 = vsub.s32 (!%p162_p10), 4, %v218_v7  ;;  %v246_v11 = vsub.s32 (!%p162_p10), 1, %v218_v7  ;;  %v250_v12 = vsub.s32 (!%p162_p10), 5, %v218_v7  ;;  %s488_s5 = scalar_lea.vmem (!%p162_p10), %s674_s28, 256  ;;  %s569_s6 = smov (!%p162_p10), [#allocation2]  }
  0x13   : > { %v273_v15 = vsub.s32 (!%p162_p10), 2, %v218_v7  ;;  %v277_v16 = vsub.s32 (!%p162_p10), 6, %v218_v7  ;;  %v300_v17 = vsub.s32 (!%p162_p10), 3, %v218_v7  ;;  %v304_v18 = vsub.s32 (!%p162_p10), 7, %v218_v7  ;;  %p489_p12 = scmp.ne.s32.totalorder (!%p162_p10), %s674_s28, %s488_s5  ;;  %s492_s7 = sshll.u32 (!%p162_p10), %s569_s6, 4  ;;  %s493_s7 = int_to_ptr.vmem [resolvable:$false] %s492_s7 }
  0x14   : > { %268 = vperm.xlu1 (!%p162_p10), %487, %v203_v3   ;;  %208 = vperm.xlu0 (!%p162_p10), %486, %v205_v4   ;;  %s494_s8 = scalar_lea.vmem (!%p162_p10), %s493_s7, 512  ;;  %p495_p1 = scmp.lt.s32.totalorder (!%p162_p10), %s674_s28, %s493_s7 }
  0x15   : > { %p490_p13 = pnand (!%p162_p10), %p489_p12, %p630_p4  ;;  %p496_p2 = scmp.lt.s32.totalorder (!%p162_p10), %s494_s8, %s488_s5 }
  0x16   : > { %s191_s9 = scalar_select %p190_p11, %s558_s15, 1 }
  0x17   : > { %s323_s15 = scalar_lea.sflag [#allocation3], %s186_s21  ;;  %p491_p0 = pneg %p490_p13 }
  0x18   : > { %295 = vperm.xlu0 %486, %v204_v5   ;;  %s428_s10 = sshll.u32 %s191_s9, 3  ;;  %p497_p3 = por %p496_p2, %p495_p1 }
  0x19   : > { %s197_s19 = scalar_lea.vmem %s721_s0, %s428_s10 }
  0x1a   : > { %v200_v10 = vld [vmem:[%s197_s19] sm:$0xff]  ;;  %p498_p5 = pnand %p497_p3, %p491_p0 }
  0x1b   : > { %v220_v13 = vrot.slane %v200_v10, %v219_v8  ;;  %v224_v14 = vrot.slane %v200_v10, %v223_v9  ;;  %v247_v19 = vrot.slane %v200_v10, %v246_v11  ;;  %v251_v20 = vrot.slane %v200_v10, %v250_v12 }
  0x1c   : > { %v274_v23 = vrot.slane %v200_v10, %v273_v15  ;;  %v278_v24 = vrot.slane %v200_v10, %v277_v16  ;;  %v301_v27 = vrot.slane %v200_v10, %v300_v17  ;;  %v305_v28 = vrot.slane %v200_v10, %v304_v18 }
  0x1d   : > { %v230_v21 = vrot.slane %v220_v13, %v219_v8  ;;  %v234_v22 = vrot.slane %v224_v14, %v219_v8  ;;  %v257_v29 = vrot.slane %v247_v19, %v246_v11  ;;  %v261_v30 = vrot.slane %v251_v20, %v246_v11 }
  0x1e   : > { %v284_v33 = vrot.slane %v274_v23, %v273_v15  ;;  %v288_v34 = vrot.slane %v278_v24, %v273_v15  ;;  %v311_v37 = vrot.slane %v301_v27, %v300_v17  ;;  %v315_v38 = vrot.slane %v305_v28, %v300_v17 }
  0x8f   : > { %v242_v25 = vpop.permute.xlu1 %241  ;;  %v214_v26 = vpop.permute.xlu0 %213 }
  0x90   : > { %v235_v31 = vmul.f32 %v230_v21, %v214_v26  ;;  %v236_v32 = vmul.f32 %v234_v22, %v214_v26  ;;  %v262_v39 = vmul.f32 %v257_v29, %v242_v25  ;;  %v263_v40 = vmul.f32 %v261_v30, %v242_v25 }
  0x93   : > { %v269_v35 = vpop.permute.xlu1 %268  ;;  %v209_v36 = vpop.permute.xlu0 %208 }
  0x94   : > { %v237_v41 = vadd.f32 %v235_v31, %v209_v36  ;;  %v238_v42 = vadd.f32 %v236_v32, %v209_v36  ;;  %v289_v43 = vmul.f32 %v284_v33, %v269_v35  ;;  %v290_v44 = vmul.f32 %v288_v34, %v269_v35 }
  0x96   : > { %v264_v45 = vadd.f32 %v262_v39, %v237_v41  ;;  %v265_v46 = vadd.f32 %v263_v40, %v238_v42 }
  0x97   : > { %v296_v47 = vpop.permute.xlu0 %295 }
  0x98   : > { %v291_v48 = vadd.f32 %v289_v43, %v264_v45  ;;  %v292_v49 = vadd.f32 %v290_v44, %v265_v46  ;;  %v316_v50 = vmul.f32 %v311_v37, %v296_v47  ;;  %v317_v51 = vmul.f32 %v315_v38, %v296_v47 }
  0x9a   : > { %v318_v52 = vadd.f32 %v316_v50, %v291_v48  ;;  %v319_v53 = vadd.f32 %v317_v51, %v292_v49 }
  0x9c   : > { %320 = vst [vmem:[%s188_s27] sm:$0xff] %v318_v52  ;;  %321 = vst [vmem:[%s188_s27 + $0x8] sm:$0xff] %v319_v53 }
  0x9d   : > { %501 = shalt.err (!%p498_p5)
}
  0x9e   : > { %s502_s9 = scalar_lea.hbm %s672_s4, 256  ;;  %s506_s18 = scalar_lea.hbm %s724_s3, 512 }
  0x9f   : > { %p503_p6 = scmp.ne.s32.totalorder %s672_s4, %s502_s9  ;;  %p507_p10 = scmp.lt.u32.totalorder %s672_s4, %s724_s3 }
  0xa0   : > { %p508_p11 = scmp.lt.u32.totalorder %s506_s18, %s502_s9  ;;  %p510_p13 = scmp.lt.u32.totalorder %s502_s9, %s672_s4 }
  0xa1   : > { %p504_p7 = pnand %p503_p6, %p630_p4 }
  0xa2   : > { %p509_p12 = por %p508_p11, %p507_p10 }
  0xa3   : > { %p505_p9 = pneg %p504_p7 }
  0xa4   : > { %p511_p0 = por %p510_p13, %p509_p12 }
  0xa6   : > { %p512_p1 = pnand %p511_p0, %p505_p9 }
  0xa8   : > { %515 = shalt.err (!%p512_p1)
}
  0xa9   : > { %430 = dma.vmem_to_hbm [thread:$0]  (%p630_p4), %s674_s28, 256, %s672_s4, %s323_s15  }
  0xaa PF: > { %p436_p2 = scmp.ge.s32.totalorder %s566_s17, 2  ;;  %s351_s23 = sand.u32 1, %s546_s12  }
  0xab   : > { %s352_s26 = scalar_lea.sflag [#allocation3], %s351_s23 }
  0xac   : > { %p433_p3 = pnand %p436_p2, %p637_p8 }
  0xae   : > { %541 = dma.done.wait (!%p433_p3), %s352_s26, 256  }
  0xaf   : > { %543 = vsyncadd (!%p433_p3), %s352_s26, 4294967040  ;;  %s16_s17 = sadd.s32 1, %s566_s17   ;;  %s727_s12 = smov %s550_s13 }
  0xb0   : > { %p13_p5 = scmp.ge.s32.totalorder %s16_s17, 4   ;;  %s728_s13 = smov %s554_s14 }
  0xb1   : > { %s729_s14 = smov %s643_s25  ;;  %s730_s15 = smov %s562_s16 }
  0xb2   : > { %s731_s16 = smov %s733_s20  ;;  %15 = sbr.rel (!%p13_p5) target bundleno = 4 (0x4), region = 67 }
  0xb9   :  { %357 = vsyncpa [#allocation3], 1 }
  0xba   :  { %359 = vsyncpa [#allocation3 + $0x1], 1 }

</bundles_post_ra>
